<compile_context>
chip_gen: v7x
topology: tpu7x:2x2x1
jax: 0.10.0
libtpu: 0.0.40
codegen_flags: <defaults>
</compile_context>

<pallas_src>
import functools

import jax
import jax.numpy as jnp
from jax import lax
from jax.experimental import pallas as pl
from jax.experimental.pallas import tpu as pltpu

_MIB = 1024 * 1024

# Tokens per grid step (output tile height).
_DEFAULT_TILE_TOKENS = 512
# Max vocabulary size for the one-hot MXU gather path.
_DEFAULT_ONEHOT_MAX_ROWS = 1024
# In-flight per-row DMA depth for the HBM gather path (power of two).
_DMA_DEPTH = 32
# Below this table size the one-time table DMA is negligible, so the resident
# path is used regardless of the traffic ratio.
_SMALL_TABLE_BYTES = 2 * _MIB
# Resident path only if table_bytes <= ratio * (bytes the HBM gather reads).
_TRAFFIC_RATIO = 1.0


def _round_up(x: int, m: int) -> int:
    return (x + m - 1) // m * m


def _vmem_budget():
    """Generation-aware (resident-table byte cap, scoped-VMEM limit), per core."""
    try:
        vmem_bytes = int(pltpu.get_tpu_info().vmem_capacity_bytes)
    except Exception:
        vmem_bytes = 64 * _MIB  # v7x per-TC size; conservative for v5e/v6e.
    # Scoped-VMEM limit: leave headroom below physical capacity.
    vmem_limit = max(min(vmem_bytes - 16 * _MIB, 112 * _MIB), 32 * _MIB)
    # Table cap sized so even a double-buffered table (+ output tiles) fits, in
    # case the single-buffer (pl.Buffered(1)) request is unavailable.
    table_cap = max((vmem_limit - 8 * _MIB) // 2, 8 * _MIB)
    return table_cap, vmem_limit


# --------------------------------------------------------------------------
# Kernels
# --------------------------------------------------------------------------

def _onehot_gather_kernel(idx_ref, w_ref, out_ref):
    """Small-vocabulary gather: one_hot(idx) @ table on the MXU."""
    tile = out_ref.shape[0]
    vocab = w_ref.shape[0]
    idx = idx_ref[...]                                          # (tile, 1) int32
    rows = lax.broadcasted_iota(jnp.int32, (tile, vocab), 1)    # (tile, V)
    one_hot = (rows == idx).astype(w_ref.dtype)                 # exact 0.0 / 1.0
    out_ref[...] = jnp.dot(
        one_hot, w_ref[...],
        preferred_element_type=jnp.float32,
        precision=lax.Precision.HIGHEST,                        # keep rows exact
    ).astype(out_ref.dtype)


def _copy_gather_kernel(idx_ref, w_ref, out_ref, *, group):
    """Medium-table gather from a VMEM-resident table.

    Assembles `group` rows (a full sublane group) per store so stores are
    (group, D) unmasked blocks instead of per-row masked vst's.
    """
    tile = out_ref.shape[0]

    def body(g, carry):
        start = pl.multiple_of(g * group, group)
        rows = [w_ref[pl.ds(idx_ref[start + r], 1), :] for r in range(group)]
        out_ref[pl.ds(start, group), :] = jnp.concatenate(rows, axis=0)
        return carry

    lax.fori_loop(0, tile // group, body, 0, unroll=2)


def _hbm_gather_kernel(nvalid_ref, idx_ref, w_hbm_ref, out_ref, copy_sems):
    """Gather rows straight from HBM into a (tile, D) output block via a ring
    of in-flight per-row DMAs (depth = copy_sems.shape[0], a power of two)."""
    tile = out_ref.shape[0]
    depth = copy_sems.shape[0]
    base = pl.program_id(0) * tile
    # Valid (non-padded) rows in this tile; padded tail rows issue no DMAs.
    n_valid = jnp.clip(nvalid_ref[0] - base, 0, tile)

    def row_copy(t, row):
        return pltpu.make_async_copy(
            w_hbm_ref.at[pl.ds(row, 1), :],
            out_ref.at[pl.ds(t, 1), :],
            copy_sems.at[t & (depth - 1)],
        )

    # Prime the ring: keep up to `depth` row DMAs in flight before any wait.
    for t in range(min(depth, tile)):
        @pl.when(t < n_valid)
        def _(t=t):
            row_copy(t, idx_ref[t]).start()

    def body(t, carry):
        nxt = t + depth
        # Read the next index *before* the wait: .wait() breaks SMEM sst->sld
        # forwarding and would stall the next DMA's address computation.
        row_next = idx_ref[jnp.minimum(nxt, tile - 1)]

        @pl.when(t < n_valid)
        def _():
            # Wait amount depends only on the slice shape / semaphore slot.
            row_copy(t, 0).wait()

        @pl.when(nxt < n_valid)
        def _():
            row_copy(nxt, row_next).start()

        return carry

    lax.fori_loop(0, tile, body, 0)


# --------------------------------------------------------------------------
# pallas_call wrappers
# --------------------------------------------------------------------------

def _embedding_resident(kernel, idx_arg, idx_spec, weight, n_tiles, tile,
                        vmem_limit):
    num_embeddings, embed_dim = weight.shape
    out_shape = jax.ShapeDtypeStruct((n_tiles * tile, embed_dim), weight.dtype)
    out_spec = pl.BlockSpec((tile, embed_dim), lambda i: (i, 0))
    params = pltpu.CompilerParams(
        dimension_semantics=("parallel",),
        vmem_limit_bytes=int(vmem_limit),
    )

    def run(weight_spec):
        return pl.pallas_call(
            kernel,
            out_shape=out_shape,
            grid=(n_tiles,),
            in_specs=[idx_spec, weight_spec],
            out_specs=out_spec,
            compiler_params=params,
        )(idx_arg, weight)

    table_spec = dict(block_shape=(num_embeddings, embed_dim),
                      index_map=lambda i: (0, 0))
    try:
        # The table's block index never changes, so a single buffer suffices:
        # halves the table's VMEM footprint vs. the default double buffering.
        return run(pl.BlockSpec(**table_spec, pipeline_mode=pl.Buffered(1)))
    except Exception:
        # TODO(synk): pipeline_mode=pl.Buffered(1) unavailable in this JAX
        # build; fall back to the default (double-buffered) weight block.
        return run(pl.BlockSpec(**table_spec))


def _embedding_hbm(weight, idx_flat, n_tokens, n_tiles, tile):
    _, embed_dim = weight.shape
    n_valid_arr = jnp.array([n_tokens], dtype=jnp.int32)
    return pl.pallas_call(
        _hbm_gather_kernel,
        out_shape=jax.ShapeDtypeStruct((n_tiles * tile, embed_dim), weight.dtype),
        grid=(n_tiles,),
        in_specs=[
            # Valid-token count (whole array in SMEM).
            pl.BlockSpec(memory_space=pltpu.MemorySpace.SMEM),
            # Per-tile indices in SMEM (scalar-addressed DMA descriptors).
            pl.BlockSpec((tile,), lambda i: (i,),
                         memory_space=pltpu.MemorySpace.SMEM),
            # Weight stays in HBM; rows gathered with manual DMAs.
            pl.BlockSpec(memory_space=pl.ANY),
        ],
        out_specs=pl.BlockSpec((tile, embed_dim), lambda i: (i, 0)),
        scratch_shapes=[pltpu.SemaphoreType.DMA((_DMA_DEPTH,))],
        compiler_params=pltpu.CompilerParams(
            dimension_semantics=("parallel",),
        ),
    )(n_valid_arr, idx_flat, weight)


def embedding(weight: jax.Array, indices: jax.Array, *,
              tile_tokens: int = _DEFAULT_TILE_TOKENS,
              onehot_max_rows: int = _DEFAULT_ONEHOT_MAX_ROWS,
              force_path: str | None = None) -> jax.Array:
    """Pallas equivalent of torch.embedding(weight, indices).

    force_path: None (heuristic) | "onehot" | "copy" | "hbm"   (testing hook).
    """
    num_embeddings, embed_dim = weight.shape
    in_shape = indices.shape

    idx_flat = indices.reshape(-1).astype(jnp.int32)
    idx_flat = jnp.clip(idx_flat, 0, num_embeddings - 1)
    n_tokens = idx_flat.shape[0]
    if n_tokens == 0:
        return jnp.zeros((*in_shape, embed_dim), weight.dtype)

    # Coalesce tokens into (tile, D) output blocks.  `tile` is a multiple of
    # 128 (lane-friendly index blocks) unless a single tile covers everything.
    tile = min(_round_up(tile_tokens, 128), _round_up(n_tokens, 16))
    n_pad = _round_up(n_tokens, tile)
    if n_pad != n_tokens:
        idx_flat = jnp.pad(idx_flat, (0, n_pad - n_tokens))
    n_tiles = n_pad // tile

    itemsize = weight.dtype.itemsize
    table_bytes = num_embeddings * embed_dim * itemsize
    gather_bytes = n_tokens * embed_dim * itemsize
    table_cap, vmem_limit = _vmem_budget()

    if force_path is None:
        resident_ok = table_bytes <= table_cap and (
            table_bytes <= _SMALL_TABLE_BYTES
            or table_bytes <= _TRAFFIC_RATIO * gather_bytes)
        if resident_ok:
            path = "onehot" if num_embeddings <= onehot_max_rows else "copy"
        else:
            path = "hbm"
    else:
        path = force_path

    if path == "onehot":
        idx_col = idx_flat.reshape(n_pad, 1)   # (tile, 1) VMEM column blocks
        idx_spec = pl.BlockSpec((tile, 1), lambda i: (i, 0))
        out_flat = _embedding_resident(_onehot_gather_kernel, idx_col, idx_spec,
                                       weight, n_tiles, tile, vmem_limit)
    elif path == "copy":
        group = 16 if itemsize <= 2 else 8     # full sublane group per store
        kernel = functools.partial(_copy_gather_kernel, group=group)
        idx_spec = pl.BlockSpec((tile,), lambda i: (i,),
                                memory_space=pltpu.MemorySpace.SMEM)
        out_flat = _embedding_resident(kernel, idx_flat, idx_spec,
                                       weight, n_tiles, tile, vmem_limit)
    elif path == "hbm":
        out_flat = _embedding_hbm(weight, idx_flat, n_tokens, n_tiles, tile)
    else:
        raise ValueError(f"unknown force_path: {force_path!r}")

    return out_flat[:n_tokens].reshape(*in_shape, embed_dim)


if __name__ == "__main__":
    key = jax.random.PRNGKey(0)
    k_w, k_idx = jax.random.split(key)

    num_embeddings = 64
    embedding_dim = 128
    batch, seq = 2, 8

    # Module __init__: weight = torch.randn(num_embeddings, embedding_dim).
    weight = jax.random.normal(k_w, (num_embeddings, embedding_dim), jnp.float32)
    indices = jax.random.randint(k_idx, (batch, seq), 0, num_embeddings, jnp.int32)

    ref = jnp.take(weight, indices, axis=0)   # torch.embedding reference

    # Default heuristic: tiny table -> VMEM-resident one-hot MXU gather.
    out = jax.block_until_ready(embedding(weight, indices))
    assert out.shape == (batch, seq, embedding_dim)
    assert out.dtype == weight.dtype
    assert jnp.array_equal(out, ref), "default (one-hot MXU) path mismatch"

    # Exercise the medium-table resident row-copy path on the same inputs.
    out_copy = jax.block_until_ready(embedding(weight, indices, force_path="copy"))
    assert jnp.array_equal(out_copy, ref), "resident copy path mismatch"

    # Exercise the large-table HBM DMA-ring gather path.
    out_hbm = jax.block_until_ready(embedding(weight, indices, force_path="hbm"))
    assert jnp.array_equal(out_hbm, ref), "HBM gather path mismatch"

    print("KERNEL_OK")
</pallas_src>

<mosaic_0001>
module attributes {stable_mosaic.version = 11 : i64} {
  func.func @_onehot_gather_kernel(%arg0: i32, %arg1: memref<16x1xi32, #tpu.memory_space<vmem>>, %arg2: memref<64x128xf32, #tpu.memory_space<vmem>>, %arg3: memref<16x128xf32, #tpu.memory_space<vmem>>) attributes {dimension_semantics = [#tpu.dimension_semantics<parallel>], iteration_bounds = array<i64: 1>, scalar_prefetch = 0 : i64, scratch_operands = 0 : i64, tpu.core_type = #tpu.core_type<tc>, window_params = [{transform_indices = @transform_0, window_bounds = array<i64: 16, 1>}, {pipeline_mode = #tpu.pipeline_mode<synchronous>, transform_indices = @transform_1, window_bounds = array<i64: 64, 128>}, {transform_indices = @transform_2, window_bounds = array<i64: 16, 128>}]} {
    %c0 = arith.constant 0 : index
    %c0_0 = arith.constant 0 : index
    %0 = vector.load %arg1[%c0, %c0_0] : memref<16x1xi32, #tpu.memory_space<vmem>>, vector<16x1xi32>
    %1 = tpu.iota {dimensions = array<i32: 1>} : vector<16x64xi32>
    %2 = vector.broadcast %0 : vector<16x1xi32> to vector<16x64xi32>
    %3 = arith.cmpi eq, %1, %2 : vector<16x64xi32>
    %4 = arith.extui %3 : vector<16x64xi1> to vector<16x64xi32>
    %5 = arith.sitofp %4 : vector<16x64xi32> to vector<16x64xf32>
    %c0_1 = arith.constant 0 : index
    %c0_2 = arith.constant 0 : index
    %6 = vector.load %arg2[%c0_1, %c0_2] : memref<64x128xf32, #tpu.memory_space<vmem>>, vector<64x128xf32>
    %cst = arith.constant dense<0.000000e+00> : vector<16x128xf32>
    %7 = tpu.matmul %5, %6, %cst {dimension_numbers = #tpu.dot_dimension_numbers<[1], [0], [0], [1], [0, 0, 1, 1], [], []>, precision = #tpu.contract_precision<fp32>} : vector<16x64xf32>, vector<64x128xf32>, vector<16x128xf32> -> vector<16x128xf32>
    %c0_3 = arith.constant 0 : index
    %c0_4 = arith.constant 0 : index
    %8 = vector.load %arg3[%c0_3, %c0_4] : memref<16x128xf32, #tpu.memory_space<vmem>>, vector<16x128xf32>
    tpu.vector_store %arg3[%c0_3, %c0_4], %7 {strides = array<i32>} : memref<16x128xf32, #tpu.memory_space<vmem>>, vector<16x128xf32>,
    return
  }
  func.func @transform_0(%arg0: i32) -> (i32, i32) {
    %c0_i32 = arith.constant 0 : i32
    %c0_i32_0 = arith.constant 0 : i32
    return %arg0, %c0_i32 : i32, i32
  }
  func.func @transform_1(%arg0: i32) -> (i32, i32) {
    %c0_i32 = arith.constant 0 : i32
    %c0_i32_0 = arith.constant 0 : i32
    %c0_i32_1 = arith.constant 0 : i32
    return %c0_i32, %c0_i32_0 : i32, i32
  }
  func.func @transform_2(%arg0: i32) -> (i32, i32) {
    %c0_i32 = arith.constant 0 : i32
    %c0_i32_0 = arith.constant 0 : i32
    return %arg0, %c0_i32 : i32, i32
  }
}

module attributes {stable_mosaic.version = 11 : i64} {
  func.func @_onehot_gather_kernel(%arg0: i32, %arg1: memref<16x1xi32, #tpu.memory_space<vmem>>, %arg2: memref<64x128xf32, #tpu.memory_space<vmem>>, %arg3: memref<16x128xf32, #tpu.memory_space<vmem>>) attributes {dimension_semantics = [#tpu.dimension_semantics<parallel>], iteration_bounds = array<i64: 1>, scalar_prefetch = 0 : i64, scratch_operands = 0 : i64, tpu.core_type = #tpu.core_type<tc>, window_params = [{transform_indices = @transform_0, window_bounds = array<i64: 16, 1>}, {pipeline_mode = #tpu.pipeline_mode<synchronous>, transform_indices = @transform_1, window_bounds = array<i64: 64, 128>}, {transform_indices = @transform_2, window_bounds = array<i64: 16, 128>}]} {
    %c0 = arith.constant 0 : index
    %c0_0 = arith.constant 0 : index
    %0 = vector.load %arg1[%c0, %c0_0] : memref<16x1xi32, #tpu.memory_space<vmem>>, vector<16x1xi32>
    %1 = tpu.iota {dimensions = array<i32: 1>} : vector<16x64xi32>
    %2 = vector.broadcast %0 : vector<16x1xi32> to vector<16x64xi32>
    %3 = arith.cmpi eq, %1, %2 : vector<16x64xi32>
    %4 = arith.extui %3 : vector<16x64xi1> to vector<16x64xi32>
    %5 = arith.sitofp %4 : vector<16x64xi32> to vector<16x64xf32>
    %c0_1 = arith.constant 0 : index
    %c0_2 = arith.constant 0 : index
    %6 = vector.load %arg2[%c0_1, %c0_2] : memref<64x128xf32, #tpu.memory_space<vmem>>, vector<64x128xf32>
    %cst = arith.constant dense<0.000000e+00> : vector<16x128xf32>
    %7 = tpu.matmul %5, %6, %cst {dimension_numbers = #tpu.dot_dimension_numbers<[1], [0], [0], [1], [0, 0, 1, 1], [], []>, precision = #tpu.contract_precision<fp32>} : vector<16x64xf32>, vector<64x128xf32>, vector<16x128xf32> -> vector<16x128xf32>
    %c0_3 = arith.constant 0 : index
    %c0_4 = arith.constant 0 : index
    %8 = vector.load %arg3[%c0_3, %c0_4] : memref<16x128xf32, #tpu.memory_space<vmem>>, vector<16x128xf32>
    tpu.vector_store %arg3[%c0_3, %c0_4], %7 {strides = array<i32>} : memref<16x128xf32, #tpu.memory_space<vmem>>, vector<16x128xf32>,
    return
  }
  func.func @transform_0(%arg0: i32) -> (i32, i32) {
    %c0_i32 = arith.constant 0 : i32
    %c0_i32_0 = arith.constant 0 : i32
    return %arg0, %c0_i32 : i32, i32
  }
  func.func @transform_1(%arg0: i32) -> (i32, i32) {
    %c0_i32 = arith.constant 0 : i32
    %c0_i32_0 = arith.constant 0 : i32
    %c0_i32_1 = arith.constant 0 : i32
    return %c0_i32, %c0_i32_0 : i32, i32
  }
  func.func @transform_2(%arg0: i32) -> (i32, i32) {
    %c0_i32 = arith.constant 0 : i32
    %c0_i32_0 = arith.constant 0 : i32
    return %arg0, %c0_i32 : i32, i32
  }
}

</mosaic_0001>

<bundles_post_ra>
// kernel: tpu_custom_call.1
= control target key start
LH: loop header
LB: loop body
LE: loop exit
PB: predicated region body
PF: predicated region fallthrough
CT: control target
= control target key end

     0   :  { %7 = vsyncpa [#allocation3], 0  ;;  %s1100_s0 = inlined_call_operand.vmem [shape: s32[16,1], index: 0, kind: input, shape index: {}]   ;;  %s1101_s1 = inlined_call_operand.hbm [shape: f32[64,128], index: 1, kind: input, shape index: {}]   ;;  %s1102_s2 = inlined_call_operand.hbm [shape: f32[16,128], index: 2, kind: output, shape index: {}]  }
   0x1   :  { %8 = vsyncpa [#allocation4], 0  ;;  %s999_s9 = smov [#allocation2]   ;;  %s951_s13 = scalar_lea.hbm %s1101_s1, 1024 }
   0x2   :  { %s16_s10 = sshll.u32 %s999_s9, 4  ;;  %p952_p0 = scmp.ne.s32.totalorder %s1101_s1, %s951_s13  ;;  %s17_s10 = int_to_ptr.vmem [resolvable:$true] %s16_s10 }
   0x3   :  { %p955_p1 = scmp.lt.u32.totalorder %s951_s13, %s1101_s1 }
   0x5   :  { %p957_p2 = pnand %p955_p1, %p952_p0 }
   0x7   :  { %960 = shalt.err (!%p957_p2)
}
   0x8   :  { %s961_s18 = scalar_lea.vmem %s17_s10, 1024  ;;  %p966_p4 = scmp.lt.s32.totalorder %s17_s10, %s17_s10 }
   0x9   :  { %p962_p3 = scmp.ne.s32.totalorder %s17_s10, %s961_s18  ;;  %p967_p5 = scmp.lt.s32.totalorder %s961_s18, %s961_s18 }
   0xb   :  { %p968_p6 = por %p967_p5, %p966_p4 }
   0xd   :  { %p969_p7 = pnand %p968_p6, %p962_p3 }
   0xf   :  { %972 = shalt.err (!%p969_p7)
}
  0x10   :  { %s1000_s19 = smov 128   ;;  %s1001_s20 = smov 8  }
  0x11   :  { %22 = dma.hbm_to_vmem [thread:$0]  %s1101_s1, 1024, %s17_s10, [#allocation3], %s1000_s19, %s1000_s19, %s1001_s20  }
  0x12   :  { %995 = dma.done.wait [#allocation3], 1024  }
  0x13   :  { %996 = vsyncadd [#allocation3], 4294966272  ;;  %v1002_v0 = vmov 0   ;;  %v26_v1 = vld [vmem:[%s1100_s0] sm:$0xff]  ;;  %v43_v3 = vld [vmem:[#allocation2 + $0x8] sm:$0xff]  ;;  %vm50_vm0 = vcmask 523264  }
  0x14   :  { %950 = vset.pattern.permute.xlu0 %v1002_v0  ;;  %v42_v2 = vld [vmem:[#allocation2] sm:$0xff]  ;;  %v44_v5 = vld [vmem:[#allocation2 + $0x10] sm:$0xff]  ;;  %v45_v6 = vld [vmem:[#allocation2 + $0x18] sm:$0xff]  ;;  %v61_v8 = vand.u32 4294901760, %v43_v3 }
  0x15   :  { %31 = vperm.xlu0 %950, %v26_v1   ;;  %v58_v4 = vand.u32 4294901760, %v42_v2  ;;  %v27_v7 = vld [vmem:[%s1100_s0 + $0x8] sm:$0xff]  ;;  %v64_v9 = vand.u32 4294901760, %v44_v5  ;;  %v67_v10 = vand.u32 4294901760, %v45_v6  ;;  %v46_v11 = vld [vmem:[#allocation2 + $0x20] sm:$0xff]  ;;  %v48_v17 = vld [vmem:[#allocation2 + $0x30] sm:$0xff] }
  0x16   :  { %v47_v12 = vld [vmem:[#allocation2 + $0x28] sm:$0xff]  ;;  %v70_v15 = vand.u32 4294901760, %v46_v11  ;;  %v49_v18 = vld [vmem:[#allocation2 + $0x38] sm:$0xff]  ;;  %v159_v20 = vsub.f32 %v43_v3, %v61_v8  ;;  %v76_v21 = vand.u32 4294901760, %v48_v17  ;;  %v28_v3 = vlaneseq  ;;  %s1004_s0 = smov [#allocation5]  }
  0x17   :  { %v1041_v13 = vpack.c.bf16 %v61_v8, %v58_v4  ;;  %v1043_v14 = vpack.c.bf16 %v67_v10, %v64_v9  ;;  %v73_v16 = vand.u32 4294901760, %v47_v12  ;;  %v152_v19 = vsub.f32 %v42_v2, %v58_v4  ;;  %s644_s1 = sshll.u32 %s1004_s0, 4  ;;  %s645_s1 = int_to_ptr.vmem [resolvable:$true] %s644_s1 }
  0x18   :  { %v79_v22 = vand.u32 4294901760, %v49_v18  ;;  %v160_v24 = vand.u32 4294901760, %v159_v20  ;;  %v166_v28 = vsub.f32 %v44_v5, %v64_v9  ;;  %v173_v29 = vsub.f32 %v45_v6, %v67_v10  ;;  %s973_s27 = scalar_lea.vmem %s645_s1, 256  ;;  %p978_p9 = scmp.lt.s32.totalorder %s645_s1, %s645_s1 }
  0x19   :  { %34 = vperm.xlu0 %950, %v27_v7   ;;  %887 = vmatprep.subr.bf16.mxu0 %v1041_v13  ;;  %v153_v23 = vand.u32 4294901760, %v152_v19  ;;  %v1051_v25 = vpack.c.bf16 %v73_v16, %v70_v15  ;;  %v180_v38 = vsub.f32 %v46_v11, %v70_v15  ;;  %v187_v39 = vsub.f32 %v47_v12, %v73_v16  ;;  %p974_p8 = scmp.ne.s32.totalorder %s645_s1, %s973_s27  ;;  %p979_p10 = scmp.lt.s32.totalorder %s973_s27, %s973_s27 }
  0x1a   :  { %839 = vmatprep.subr.bf16.mxu1 %v1041_v13  ;;  %889 = vmatpush3.bf16.msra.mxu0 %v1041_v13  ;;  %v161_v27 = vsub.f32 %v159_v20, %v160_v24  ;;  %v1055_v30 = vpack.c.bf16 %v79_v22, %v76_v21  ;;  %v167_v33 = vand.u32 4294901760, %v166_v28  ;;  %v174_v34 = vand.u32 4294901760, %v173_v29 }
  0x1b   :  { %841 = vmatpush3.bf16.msra.mxu1 %v1041_v13  ;;  %891 = vmatprep.subr.bf16.mxu0 %v1043_v14  ;;  %v154_v26 = vsub.f32 %v152_v19, %v153_v23  ;;  %v902_v40 = vpack.c.bf16 %v160_v24, %v153_v23  ;;  %v181_v44 = vand.u32 4294901760, %v180_v38  ;;  %v188_v45 = vand.u32 4294901760, %v187_v39  ;;  %p980_p11 = por %p979_p10, %p978_p9 }
  0x1c   :  { %843 = vmatprep.subr.bf16.mxu1 %v1043_v14  ;;  %v162_v32 = vand.u32 4294901760, %v161_v27  ;;  %v1059_v35 = vpack.c.bf16 %v174_v34, %v167_v33  ;;  %v168_v36 = vsub.f32 %v166_v28, %v167_v33  ;;  %v175_v37 = vsub.f32 %v173_v29, %v174_v34 }
  0x1d   :  { %v155_v31 = vand.u32 4294901760, %v154_v26  ;;  %v194_v47 = vsub.f32 %v48_v17, %v76_v21  ;;  %v201_v48 = vsub.f32 %v49_v18, %v79_v22  ;;  %v910_v49 = vpack.c.bf16 %v188_v45, %v181_v44  ;;  %p981_p12 = pnand %p980_p11, %p974_p8 }
  0x1e   :  { %893 = vmatpush3.bf16.msra.mxu0 %v1043_v14  ;;  %v169_v42 = vand.u32 4294901760, %v168_v36  ;;  %v176_v43 = vand.u32 4294901760, %v175_v37  ;;  %v182_v50 = vsub.f32 %v180_v38, %v181_v44  ;;  %v189_v51 = vsub.f32 %v187_v39, %v188_v45 }
  0x1f   :  { %845 = vmatpush3.bf16.msra.mxu1 %v1043_v14  ;;  %895 = vmatprep.subr.bf16.mxu0 %v1051_v25  ;;  %v854_v41 = vpack.c.bf16 %v162_v32, %v155_v31  ;;  %v195_v52 = vand.u32 4294901760, %v194_v47  ;;  %v202_v53 = vand.u32 4294901760, %v201_v48  ;;  %v870_v63 = vpack.c.bf16 %v159_v20, %v152_v19 }
  0x20   :  { %847 = vmatprep.subr.bf16.mxu1 %v1051_v25  ;;  %v858_v46 = vpack.c.bf16 %v176_v43, %v169_v42  ;;  %v183_v54 = vand.u32 4294901760, %v182_v50  ;;  %v190_v55 = vand.u32 4294901760, %v189_v51  ;;  %v874_v0 = vpack.c.bf16 %v173_v29, %v166_v28 }
  0x21   :  { %v914_v56 = vpack.c.bf16 %v202_v53, %v195_v52  ;;  %v196_v57 = vsub.f32 %v194_v47, %v195_v52  ;;  %v203_v58 = vsub.f32 %v201_v48, %v202_v53  ;;  %v878_v1 = vpack.c.bf16 %v187_v39, %v180_v38 }
  0x22   :  { %897 = vmatpush3.bf16.msra.mxu0 %v1051_v25  ;;  %v862_v59 = vpack.c.bf16 %v190_v55, %v183_v54  ;;  %v882_v2 = vpack.c.bf16 %v201_v48, %v194_v47  ;;  %v29_v4 = vand.u32 127, %v28_v3  ;;  %v1003_v6 = vmov 0.0  }
  0x23   :  { %849 = vmatpush3.bf16.msra.mxu1 %v1051_v25  ;;  %899 = vmatprep.subr.bf16.mxu0 %v1055_v30  ;;  %v197_v60 = vand.u32 4294901760, %v196_v57  ;;  %v204_v61 = vand.u32 4294901760, %v203_v58 }
  0x24   :  { %851 = vmatprep.subr.bf16.mxu1 %v1055_v30 }
  0x25   :  { %v866_v62 = vpack.c.bf16 %v204_v61, %v197_v60 }
  0x26   :  { %901 = vmatpush3.bf16.msra.mxu0 %v1055_v30 }
  0x27   :  { %853 = vmatpush3.bf16.msra.mxu1 %v1055_v30  ;;  %903 = vmatprep.subr.bf16.mxu0 %v902_v40 }
  0x28   :  { %855 = vmatprep.subr.bf16.mxu1 %v854_v41 }
  0x94   :  { %v32_v5 = vpop.permute.xlu0 %31 }
  0x95   :  { %vm36_vm1 = vcmp.eq.s32.totalorder %v29_v4, %v32_v5 }
  0x96   :  { %v656_v7 = vsel %vm36_vm1, 1.0, %v1003_v6 }
  0x97   :  { %v52_v8 = vsel %vm50_vm0, %v656_v7, 0 }
  0x98   :  { %v131_v9 = vsub.f32 %v52_v8, %v52_v8  ;;  %v35_v10 = vpop.permute.xlu0 %34 }
  0x99   :  { %vm37_vm2 = vcmp.eq.s32.totalorder %v29_v4, %v35_v10 }
  0x9a   :  { %v657_v11 = vsel %vm37_vm2, 1.0, %v1003_v6  ;;  %v132_v12 = vand.u32 4294901760, %v131_v9 }
  0x9b   :  { %v55_v15 = vsel %vm50_vm0, %v657_v11, 0 }
  0x9c   :  { %v141_v16 = vsub.f32 %v55_v15, %v55_v15  ;;  %797 = vmatprep.mubr.f32.mxu0 %v132_v12  ;;  %v133_v17 = vsub.f32 %v131_v9, %v132_v12 }
  0x9e   :  { %v134_v18 = vand.u32 4294901760, %v133_v17  ;;  %v142_v19 = vand.u32 4294901760, %v141_v16 }
  0xa0   :  { %740 = vmatprep.mubr.f32.mxu1 %v134_v18  ;;  %798 = vmatmul.mubr.f32.vlgmr.msra.gmra.mrb[0].mxu0 %v142_v19  ;;  %v143_v20 = vsub.f32 %v141_v16, %v142_v19 }
  0xa1   :  { %905 = vmatpush3.bf16.msra.mxu0 %v902_v40  ;;  %816 = vmatprep.mubr.msk.f32.mxu0 %vm50_vm0, %v656_v7 }
  0xa2   :  { %907 = vmatprep.subr.bf16.mxu0 %v1059_v35  ;;  %v144_v21 = vand.u32 4294901760, %v143_v20 }
  0xa4   :  { %741 = vmatmul.mubr.f32.vlgmr.msra.gmra.mrb[0].mxu1 %v144_v21 }
  0xa5   :  { %857 = vmatpush3.bf16.msra.mxu1 %v854_v41  ;;  %909 = vmatpush3.bf16.msra.mxu0 %v1059_v35 }
  0xa6   :  { %759 = vmatprep.mubr.msk.f32.mxu1 %vm50_vm0, %v656_v7  ;;  %859 = vmatprep.subr.bf16.mxu1 %v858_v46 }
  0xa7   :  { %911 = vmatprep.subr.bf16.mxu0 %v910_v49 }
  0xa9   :  { %861 = vmatpush3.bf16.msra.mxu1 %v858_v46  ;;  %913 = vmatpush3.bf16.msra.mxu0 %v910_v49 }
  0xaa   :  { %863 = vmatprep.subr.bf16.mxu1 %v862_v59  ;;  %915 = vmatprep.subr.bf16.mxu0 %v914_v56 }
  0xad   :  { %865 = vmatpush3.bf16.msra.mxu1 %v862_v59  ;;  %917 = vmatpush3.bf16.msra.mxu0 %v914_v56 }
  0xae   :  { %867 = vmatprep.subr.bf16.mxu1 %v866_v62  ;;  %919 = vmatprep.subr.bf16.mxu0 %v1041_v13 }
  0xb0   :  { %817 = vmatmul.mubr.msk.f32.vlgmr.msra.gmra.mrb[0].mxu0 %vm50_vm0, %v657_v11 }
  0xb1   :  { %869 = vmatpush3.bf16.msra.mxu1 %v866_v62  ;;  %921 = vmatpush3.bf16.msra.mxu0 %v1041_v13 }
  0xb2   :  { %835 = vmatprep.mubr.msk.f32.mxu0 %vm50_vm0, %v656_v7  ;;  %871 = vmatprep.subr.bf16.mxu1 %v870_v63 }
  0xb3   :  { %923 = vmatprep.subr.bf16.mxu0 %v1043_v14 }
  0xb4   :  { %760 = vmatmul.mubr.msk.f32.vlgmr.msra.gmra.mrb[0].mxu1 %vm50_vm0, %v657_v11 }
  0xb5   :  { %873 = vmatpush3.bf16.msra.mxu1 %v870_v63  ;;  %778 = vmatprep.mubr.f32.mxu1 %v131_v9 }
  0xb6   :  { %925 = vmatpush3.bf16.msra.mxu0 %v1043_v14  ;;  %875 = vmatprep.subr.bf16.mxu1 %v874_v0 }
  0xb7   :  { %927 = vmatprep.subr.bf16.mxu0 %v1051_v25 }
  0xb9   :  { %877 = vmatpush3.bf16.msra.mxu1 %v874_v0 }
  0xba   :  { %929 = vmatpush3.bf16.msra.mxu0 %v1051_v25  ;;  %879 = vmatprep.subr.bf16.mxu1 %v878_v1 }
  0xbb   :  { %931 = vmatprep.subr.bf16.mxu0 %v1055_v30 }
  0xbd   :  { %881 = vmatpush3.bf16.msra.mxu1 %v878_v1 }
  0xbe   :  { %933 = vmatpush3.bf16.msra.mxu0 %v1055_v30  ;;  %883 = vmatprep.subr.bf16.mxu1 %v882_v2 }
  0xc1   :  { %836 = vmatmul.mubr.msk.f32.vlgmr.msra.gmra.mrb[0].mxu0 %vm50_vm0, %v657_v11  ;;  %885 = vmatpush3.bf16.msra.mxu1 %v882_v2 }
  0xc4   :  { %779 = vmatmul.mubr.f32.vlgmr.msra.gmra.mrb[0].mxu1 %v141_v16 }
 0x194   :  { %v837_v13 = vpop.f32.mrb[0].mxu0 }
 0x195   :  { %v627_v22 = vpop.f32.mrb[1].mxu0 }
 0x197   :  { %v780_v14 = vpop.f32.mrb[0].mxu1 }
 0x198   :  { %v934_v23 = vadd.f32 %v837_v13, %v780_v14  ;;  %v351_v24 = vpop.f32.mrb[1].mxu1 }
 0x199   :  { %v935_v26 = vadd.f32 %v627_v22, %v351_v24 }
 0x19a   :  { %638 = vst [vmem:[#allocation5 + $0x8] sm:$0xff] %v934_v23 }
 0x19b   :  { %637 = vst [vmem:[#allocation5] sm:$0xff] %v935_v26 }
 0x19c   :  { %984 = shalt.err (!%p981_p12)
}
 0x19d   :  { %s985_s30 = scalar_lea.hbm %s1102_s2, 256 }
 0x19e   :  { %p986_p13 = scmp.ne.s32.totalorder %s1102_s2, %s985_s30  ;;  %p989_p0 = scmp.lt.u32.totalorder %s985_s30, %s1102_s2 }
 0x1a0   :  { %p991_p1 = pnand %p989_p0, %p986_p13 }
 0x1a2   :  { %994 = shalt.err (!%p991_p1)
}
 0x1a3   :  { %650 = dma.vmem_to_hbm [thread:$0]  %s645_s1, 256, %s1102_s2, [#allocation4], %s1000_s19, %s1000_s19, %s1001_s20  }
 0x1a4   :  { %997 = dma.done.wait [#allocation4], 256  }
 0x1a5   :  { %998 = vsyncadd [#allocation4], 4294967040 }
 0x1a6   :  { %654 = vsyncpa [#allocation3], 1 }
 0x1a7   :  { %655 = vsyncpa [#allocation4], 1 }

// kernel: tpu_custom_call.1
= control target key start
LH: loop header
LB: loop body
LE: loop exit
PB: predicated region body
PF: predicated region fallthrough
CT: control target
= control target key end

     0   :  { %7 = vsyncpa [#allocation3], 0  ;;  %s1100_s0 = inlined_call_operand.vmem [shape: s32[16,1], index: 0, kind: input, shape index: {}]   ;;  %s1101_s1 = inlined_call_operand.hbm [shape: f32[64,128], index: 1, kind: input, shape index: {}]   ;;  %s1102_s2 = inlined_call_operand.hbm [shape: f32[16,128], index: 2, kind: output, shape index: {}]  }
   0x1   :  { %8 = vsyncpa [#allocation4], 0  ;;  %s999_s9 = smov [#allocation2]   ;;  %s951_s13 = scalar_lea.hbm %s1101_s1, 1024 }
   0x2   :  { %s16_s10 = sshll.u32 %s999_s9, 4  ;;  %p952_p0 = scmp.ne.s32.totalorder %s1101_s1, %s951_s13  ;;  %s17_s10 = int_to_ptr.vmem [resolvable:$true] %s16_s10 }
   0x3   :  { %p955_p1 = scmp.lt.u32.totalorder %s951_s13, %s1101_s1 }
   0x5   :  { %p957_p2 = pnand %p955_p1, %p952_p0 }
   0x7   :  { %960 = shalt.err (!%p957_p2)
}
   0x8   :  { %s961_s18 = scalar_lea.vmem %s17_s10, 1024  ;;  %p966_p4 = scmp.lt.s32.totalorder %s17_s10, %s17_s10 }
   0x9   :  { %p962_p3 = scmp.ne.s32.totalorder %s17_s10, %s961_s18  ;;  %p967_p5 = scmp.lt.s32.totalorder %s961_s18, %s961_s18 }
   0xb   :  { %p968_p6 = por %p967_p5, %p966_p4 }
   0xd   :  { %p969_p7 = pnand %p968_p6, %p962_p3 }
   0xf   :  { %972 = shalt.err (!%p969_p7)
}
  0x10   :  { %s1000_s19 = smov 128   ;;  %s1001_s20 = smov 8  }
  0x11   :  { %22 = dma.hbm_to_vmem [thread:$0]  %s1101_s1, 1024, %s17_s10, [#allocation3], %s1000_s19, %s1000_s19, %s1001_s20  }
  0x12   :  { %995 = dma.done.wait [#allocation3], 1024  }
  0x13   :  { %996 = vsyncadd [#allocation3], 4294966272  ;;  %v1002_v0 = vmov 0   ;;  %v26_v1 = vld [vmem:[%s1100_s0] sm:$0xff]  ;;  %v43_v3 = vld [vmem:[#allocation2 + $0x8] sm:$0xff]  ;;  %vm50_vm0 = vcmask 523264  }
  0x14   :  { %950 = vset.pattern.permute.xlu0 %v1002_v0  ;;  %v42_v2 = vld [vmem:[#allocation2] sm:$0xff]  ;;  %v44_v5 = vld [vmem:[#allocation2 + $0x10] sm:$0xff]  ;;  %v45_v6 = vld [vmem:[#allocation2 + $0x18] sm:$0xff]  ;;  %v61_v8 = vand.u32 4294901760, %v43_v3 }
  0x15   :  { %31 = vperm.xlu0 %950, %v26_v1   ;;  %v58_v4 = vand.u32 4294901760, %v42_v2  ;;  %v27_v7 = vld [vmem:[%s1100_s0 + $0x8] sm:$0xff]  ;;  %v64_v9 = vand.u32 4294901760, %v44_v5  ;;  %v67_v10 = vand.u32 4294901760, %v45_v6  ;;  %v46_v11 = vld [vmem:[#allocation2 + $0x20] sm:$0xff]  ;;  %v48_v17 = vld [vmem:[#allocation2 + $0x30] sm:$0xff] }
  0x16   :  { %v47_v12 = vld [vmem:[#allocation2 + $0x28] sm:$0xff]  ;;  %v70_v15 = vand.u32 4294901760, %v46_v11  ;;  %v49_v18 = vld [vmem:[#allocation2 + $0x38] sm:$0xff]  ;;  %v159_v20 = vsub.f32 %v43_v3, %v61_v8  ;;  %v76_v21 = vand.u32 4294901760, %v48_v17  ;;  %v28_v3 = vlaneseq  ;;  %s1004_s0 = smov [#allocation5]  }
  0x17   :  { %v1041_v13 = vpack.c.bf16 %v61_v8, %v58_v4  ;;  %v1043_v14 = vpack.c.bf16 %v67_v10, %v64_v9  ;;  %v73_v16 = vand.u32 4294901760, %v47_v12  ;;  %v152_v19 = vsub.f32 %v42_v2, %v58_v4  ;;  %s644_s1 = sshll.u32 %s1004_s0, 4  ;;  %s645_s1 = int_to_ptr.vmem [resolvable:$true] %s644_s1 }
  0x18   :  { %v79_v22 = vand.u32 4294901760, %v49_v18  ;;  %v160_v24 = vand.u32 4294901760, %v159_v20  ;;  %v166_v28 = vsub.f32 %v44_v5, %v64_v9  ;;  %v173_v29 = vsub.f32 %v45_v6, %v67_v10  ;;  %s973_s27 = scalar_lea.vmem %s645_s1, 256  ;;  %p978_p9 = scmp.lt.s32.totalorder %s645_s1, %s645_s1 }
  0x19   :  { %34 = vperm.xlu0 %950, %v27_v7   ;;  %887 = vmatprep.subr.bf16.mxu0 %v1041_v13  ;;  %v153_v23 = vand.u32 4294901760, %v152_v19  ;;  %v1051_v25 = vpack.c.bf16 %v73_v16, %v70_v15  ;;  %v180_v38 = vsub.f32 %v46_v11, %v70_v15  ;;  %v187_v39 = vsub.f32 %v47_v12, %v73_v16  ;;  %p974_p8 = scmp.ne.s32.totalorder %s645_s1, %s973_s27  ;;  %p979_p10 = scmp.lt.s32.totalorder %s973_s27, %s973_s27 }
  0x1a   :  { %839 = vmatprep.subr.bf16.mxu1 %v1041_v13  ;;  %889 = vmatpush3.bf16.msra.mxu0 %v1041_v13  ;;  %v161_v27 = vsub.f32 %v159_v20, %v160_v24  ;;  %v1055_v30 = vpack.c.bf16 %v79_v22, %v76_v21  ;;  %v167_v33 = vand.u32 4294901760, %v166_v28  ;;  %v174_v34 = vand.u32 4294901760, %v173_v29 }
  0x1b   :  { %841 = vmatpush3.bf16.msra.mxu1 %v1041_v13  ;;  %891 = vmatprep.subr.bf16.mxu0 %v1043_v14  ;;  %v154_v26 = vsub.f32 %v152_v19, %v153_v23  ;;  %v902_v40 = vpack.c.bf16 %v160_v24, %v153_v23  ;;  %v181_v44 = vand.u32 4294901760, %v180_v38  ;;  %v188_v45 = vand.u32 4294901760, %v187_v39  ;;  %p980_p11 = por %p979_p10, %p978_p9 }
  0x1c   :  { %843 = vmatprep.subr.bf16.mxu1 %v1043_v14  ;;  %v162_v32 = vand.u32 4294901760, %v161_v27  ;;  %v1059_v35 = vpack.c.bf16 %v174_v34, %v167_v33  ;;  %v168_v36 = vsub.f32 %v166_v28, %v167_v33  ;;  %v175_v37 = vsub.f32 %v173_v29, %v174_v34 }
  0x1d   :  { %v155_v31 = vand.u32 4294901760, %v154_v26  ;;  %v194_v47 = vsub.f32 %v48_v17, %v76_v21  ;;  %v201_v48 = vsub.f32 %v49_v18, %v79_v22  ;;  %v910_v49 = vpack.c.bf16 %v188_v45, %v181_v44  ;;  %p981_p12 = pnand %p980_p11, %p974_p8 }
  0x1e   :  { %893 = vmatpush3.bf16.msra.mxu0 %v1043_v14  ;;  %v169_v42 = vand.u32 4294901760, %v168_v36  ;;  %v176_v43 = vand.u32 4294901760, %v175_v37  ;;  %v182_v50 = vsub.f32 %v180_v38, %v181_v44  ;;  %v189_v51 = vsub.f32 %v187_v39, %v188_v45 }
  0x1f   :  { %845 = vmatpush3.bf16.msra.mxu1 %v1043_v14  ;;  %895 = vmatprep.subr.bf16.mxu0 %v1051_v25  ;;  %v854_v41 = vpack.c.bf16 %v162_v32, %v155_v31  ;;  %v195_v52 = vand.u32 4294901760, %v194_v47  ;;  %v202_v53 = vand.u32 4294901760, %v201_v48  ;;  %v870_v63 = vpack.c.bf16 %v159_v20, %v152_v19 }
  0x20   :  { %847 = vmatprep.subr.bf16.mxu1 %v1051_v25  ;;  %v858_v46 = vpack.c.bf16 %v176_v43, %v169_v42  ;;  %v183_v54 = vand.u32 4294901760, %v182_v50  ;;  %v190_v55 = vand.u32 4294901760, %v189_v51  ;;  %v874_v0 = vpack.c.bf16 %v173_v29, %v166_v28 }
  0x21   :  { %v914_v56 = vpack.c.bf16 %v202_v53, %v195_v52  ;;  %v196_v57 = vsub.f32 %v194_v47, %v195_v52  ;;  %v203_v58 = vsub.f32 %v201_v48, %v202_v53  ;;  %v878_v1 = vpack.c.bf16 %v187_v39, %v180_v38 }
  0x22   :  { %897 = vmatpush3.bf16.msra.mxu0 %v1051_v25  ;;  %v862_v59 = vpack.c.bf16 %v190_v55, %v183_v54  ;;  %v882_v2 = vpack.c.bf16 %v201_v48, %v194_v47  ;;  %v29_v4 = vand.u32 127, %v28_v3  ;;  %v1003_v6 = vmov 0.0  }
  0x23   :  { %849 = vmatpush3.bf16.msra.mxu1 %v1051_v25  ;;  %899 = vmatprep.subr.bf16.mxu0 %v1055_v30  ;;  %v197_v60 = vand.u32 4294901760, %v196_v57  ;;  %v204_v61 = vand.u32 4294901760, %v203_v58 }
  0x24   :  { %851 = vmatprep.subr.bf16.mxu1 %v1055_v30 }
  0x25   :  { %v866_v62 = vpack.c.bf16 %v204_v61, %v197_v60 }
  0x26   :  { %901 = vmatpush3.bf16.msra.mxu0 %v1055_v30 }
  0x27   :  { %853 = vmatpush3.bf16.msra.mxu1 %v1055_v30  ;;  %903 = vmatprep.subr.bf16.mxu0 %v902_v40 }
  0x28   :  { %855 = vmatprep.subr.bf16.mxu1 %v854_v41 }
  0x94   :  { %v32_v5 = vpop.permute.xlu0 %31 }
  0x95   :  { %vm36_vm1 = vcmp.eq.s32.totalorder %v29_v4, %v32_v5 }
  0x96   :  { %v656_v7 = vsel %vm36_vm1, 1.0, %v1003_v6 }
  0x97   :  { %v52_v8 = vsel %vm50_vm0, %v656_v7, 0 }
  0x98   :  { %v131_v9 = vsub.f32 %v52_v8, %v52_v8  ;;  %v35_v10 = vpop.permute.xlu0 %34 }
  0x99   :  { %vm37_vm2 = vcmp.eq.s32.totalorder %v29_v4, %v35_v10 }
  0x9a   :  { %v657_v11 = vsel %vm37_vm2, 1.0, %v1003_v6  ;;  %v132_v12 = vand.u32 4294901760, %v131_v9 }
  0x9b   :  { %v55_v15 = vsel %vm50_vm0, %v657_v11, 0 }
  0x9c   :  { %v141_v16 = vsub.f32 %v55_v15, %v55_v15  ;;  %797 = vmatprep.mubr.f32.mxu0 %v132_v12  ;;  %v133_v17 = vsub.f32 %v131_v9, %v132_v12 }
  0x9e   :  { %v134_v18 = vand.u32 4294901760, %v133_v17  ;;  %v142_v19 = vand.u32 4294901760, %v141_v16 }
  0xa0   :  { %740 = vmatprep.mubr.f32.mxu1 %v134_v18  ;;  %798 = vmatmul.mubr.f32.vlgmr.msra.gmra.mrb[0].mxu0 %v142_v19  ;;  %v143_v20 = vsub.f32 %v141_v16, %v142_v19 }
  0xa1   :  { %905 = vmatpush3.bf16.msra.mxu0 %v902_v40  ;;  %816 = vmatprep.mubr.msk.f32.mxu0 %vm50_vm0, %v656_v7 }
  0xa2   :  { %907 = vmatprep.subr.bf16.mxu0 %v1059_v35  ;;  %v144_v21 = vand.u32 4294901760, %v143_v20 }
  0xa4   :  { %741 = vmatmul.mubr.f32.vlgmr.msra.gmra.mrb[0].mxu1 %v144_v21 }
  0xa5   :  { %857 = vmatpush3.bf16.msra.mxu1 %v854_v41  ;;  %909 = vmatpush3.bf16.msra.mxu0 %v1059_v35 }
  0xa6   :  { %759 = vmatprep.mubr.msk.f32.mxu1 %vm50_vm0, %v656_v7  ;;  %859 = vmatprep.subr.bf16.mxu1 %v858_v46 }
  0xa7   :  { %911 = vmatprep.subr.bf16.mxu0 %v910_v49 }
  0xa9   :  { %861 = vmatpush3.bf16.msra.mxu1 %v858_v46  ;;  %913 = vmatpush3.bf16.msra.mxu0 %v910_v49 }
  0xaa   :  { %863 = vmatprep.subr.bf16.mxu1 %v862_v59  ;;  %915 = vmatprep.subr.bf16.mxu0 %v914_v56 }
  0xad   :  { %865 = vmatpush3.bf16.msra.mxu1 %v862_v59  ;;  %917 = vmatpush3.bf16.msra.mxu0 %v914_v56 }
  0xae   :  { %867 = vmatprep.subr.bf16.mxu1 %v866_v62  ;;  %919 = vmatprep.subr.bf16.mxu0 %v1041_v13 }
  0xb0   :  { %817 = vmatmul.mubr.msk.f32.vlgmr.msra.gmra.mrb[0].mxu0 %vm50_vm0, %v657_v11 }
  0xb1   :  { %869 = vmatpush3.bf16.msra.mxu1 %v866_v62  ;;  %921 = vmatpush3.bf16.msra.mxu0 %v1041_v13 }
  0xb2   :  { %835 = vmatprep.mubr.msk.f32.mxu0 %vm50_vm0, %v656_v7  ;;  %871 = vmatprep.subr.bf16.mxu1 %v870_v63 }
  0xb3   :  { %923 = vmatprep.subr.bf16.mxu0 %v1043_v14 }
  0xb4   :  { %760 = vmatmul.mubr.msk.f32.vlgmr.msra.gmra.mrb[0].mxu1 %vm50_vm0, %v657_v11 }
  0xb5   :  { %873 = vmatpush3.bf16.msra.mxu1 %v870_v63  ;;  %778 = vmatprep.mubr.f32.mxu1 %v131_v9 }
  0xb6   :  { %925 = vmatpush3.bf16.msra.mxu0 %v1043_v14  ;;  %875 = vmatprep.subr.bf16.mxu1 %v874_v0 }
  0xb7   :  { %927 = vmatprep.subr.bf16.mxu0 %v1051_v25 }
  0xb9   :  { %877 = vmatpush3.bf16.msra.mxu1 %v874_v0 }
  0xba   :  { %929 = vmatpush3.bf16.msra.mxu0 %v1051_v25  ;;  %879 = vmatprep.subr.bf16.mxu1 %v878_v1 }
  0xbb   :  { %931 = vmatprep.subr.bf16.mxu0 %v1055_v30 }
  0xbd   :  { %881 = vmatpush3.bf16.msra.mxu1 %v878_v1 }
  0xbe   :  { %933 = vmatpush3.bf16.msra.mxu0 %v1055_v30  ;;  %883 = vmatprep.subr.bf16.mxu1 %v882_v2 }
  0xc1   :  { %836 = vmatmul.mubr.msk.f32.vlgmr.msra.gmra.mrb[0].mxu0 %vm50_vm0, %v657_v11  ;;  %885 = vmatpush3.bf16.msra.mxu1 %v882_v2 }
  0xc4   :  { %779 = vmatmul.mubr.f32.vlgmr.msra.gmra.mrb[0].mxu1 %v141_v16 }
 0x194   :  { %v837_v13 = vpop.f32.mrb[0].mxu0 }
 0x195   :  { %v627_v22 = vpop.f32.mrb[1].mxu0 }
 0x197   :  { %v780_v14 = vpop.f32.mrb[0].mxu1 }
 0x198   :  { %v934_v23 = vadd.f32 %v837_v13, %v780_v14  ;;  %v351_v24 = vpop.f32.mrb[1].mxu1 }
 0x199   :  { %v935_v26 = vadd.f32 %v627_v22, %v351_v24 }
 0x19a   :  { %638 = vst [vmem:[#allocation5 + $0x8] sm:$0xff] %v934_v23 }
 0x19b   :  { %637 = vst [vmem:[#allocation5] sm:$0xff] %v935_v26 }
 0x19c   :  { %984 = shalt.err (!%p981_p12)
}
 0x19d   :  { %s985_s30 = scalar_lea.hbm %s1102_s2, 256 }
 0x19e   :  { %p986_p13 = scmp.ne.s32.totalorder %s1102_s2, %s985_s30  ;;  %p989_p0 = scmp.lt.u32.totalorder %s985_s30, %s1102_s2 }
 0x1a0   :  { %p991_p1 = pnand %p989_p0, %p986_p13 }
 0x1a2   :  { %994 = shalt.err (!%p991_p1)
}
 0x1a3   :  { %650 = dma.vmem_to_hbm [thread:$0]  %s645_s1, 256, %s1102_s2, [#allocation4], %s1000_s19, %s1000_s19, %s1001_s20  }
 0x1a4   :  { %997 = dma.done.wait [#allocation4], 256  }
 0x1a5   :  { %998 = vsyncadd [#allocation4], 4294967040 }
 0x1a6   :  { %654 = vsyncpa [#allocation3], 1 }
 0x1a7   :  { %655 = vsyncpa [#allocation4], 1 }

</bundles_post_ra>
